<compile_context>
chip_gen: v7x
topology: tpu7x:2x2x1
jax: 0.10.0
libtpu: 0.0.40
codegen_flags: <defaults>
</compile_context>

<pallas_src>
import jax
import jax.numpy as jnp
from jax.experimental import pallas as pl
from jax.experimental.pallas import tpu as pltpu

# ---- static "module" parameters (deterministic, set in-script) ----------------
IMG_H, IMG_W = 32, 32                 # synthetic collision image resolution
X_LOW, X_HIGH = -1.0, 1.0             # world bounds, x axis
Y_LOW, Y_HIGH = -1.0, 1.0             # world bounds, y axis
PITCH_X = (X_HIGH - X_LOW) / IMG_H    # world units per pixel (rows  <-> x)
PITCH_Y = (Y_HIGH - Y_LOW) / IMG_W    # world units per pixel (cols  <-> y)
INV_PITCH_X = 1.0 / PITCH_X
INV_PITCH_Y = 1.0 / PITCH_Y
DIST_THRESH = 0.01
WEIGHT = 5.0

MAX_TILE_N = 2048                     # points per grid step (lane axis), ~<1 MiB/blk


def _round_up(x, m):
    return ((x + m - 1) // m) * m


def _collision_kernel(pos_ref, dist_ref, out_ref):
    """pos_ref: (2, TILE_N) f32; dist_ref: (IMG_H, IMG_W) f32; out_ref: (1, TILE_N) f32."""
    tile_n = pos_ref.shape[1]

    x = pos_ref[0:1, :]                                   # (1, TILE_N)
    y = pos_ref[1:2, :]                                   # (1, TILE_N)

    # world -> pixel index (clip then truncate matches torch clamp + .to(int64))
    ix = jnp.clip((x - X_LOW) * INV_PITCH_X, 0.0, float(IMG_H - 1)).astype(jnp.int32)
    iy = jnp.clip((y - Y_LOW) * INV_PITCH_Y, 0.0, float(IMG_W - 1)).astype(jnp.int32)

    # ---- decomposed gather ----------------------------------------------------
    # column one-hot (IMG_W, TILE_N): onehot[w, n] = (w == iy[n])
    col_iota = jax.lax.broadcasted_iota(jnp.int32, (IMG_W, tile_n), 0)
    col_onehot = (col_iota == iy).astype(jnp.float32)

    # MXU: (IMG_H, IMG_W) @ (IMG_W, TILE_N) -> rows[h, n] = dist_map[h, iy[n]]
    rows = jnp.dot(dist_ref[...], col_onehot, preferred_element_type=jnp.float32)

    # row select: pick sublane ix[n] per lane n, then 32-wide sublane reduce
    row_iota = jax.lax.broadcasted_iota(jnp.int32, (IMG_H, tile_n), 0)
    d = jnp.sum(jnp.where(row_iota == ix, rows, 0.0), axis=0, keepdims=True)  # (1, TILE_N)

    # fused threshold + binarize + weight:  (d + thresh) > 0 -> weight, else 0
    out_ref[...] = jnp.where(d + DIST_THRESH > 0.0,
                             jnp.float32(WEIGHT), jnp.float32(0.0))


def image_collision_cost(pos_seq, dist_map):
    """pos_seq: (B, H, 2) f32 world coords; dist_map: (IMG_H, IMG_W) f32 SDF image."""
    B, Hn, _ = pos_seq.shape
    N = B * Hn

    # lane-dense points: (2, N), padded to a multiple of the tile width
    n_pad = _round_up(max(N, 1), 128)
    tile_n = min(MAX_TILE_N, n_pad)
    n_pad = _round_up(n_pad, tile_n)

    pos_flat = pos_seq.reshape(N, 2).astype(jnp.float32).T          # (2, N)
    pos_pad = jnp.pad(pos_flat, ((0, 0), (0, n_pad - N)))           # (2, n_pad)

    grid = (n_pad // tile_n,)
    out = pl.pallas_call(
        _collision_kernel,
        out_shape=jax.ShapeDtypeStruct((1, n_pad), jnp.float32),
        grid=grid,
        in_specs=[
            pl.BlockSpec((2, tile_n), lambda i: (0, i)),            # points tiled on lanes
            pl.BlockSpec((IMG_H, IMG_W), lambda i: (0, 0)),         # SDF stays resident
        ],
        out_specs=pl.BlockSpec((1, tile_n), lambda i: (0, i)),      # lane-dense store
        compiler_params=pltpu.CompilerParams(
            dimension_semantics=("parallel",)),
    )(pos_pad, dist_map)

    return out[0, :N].reshape(B, Hn)


def _build_dist_map():
    """Deterministic synthetic signed-distance image (stands in for the EDT of the
    PNG asset WorldImageCollision loads): positive inside a disk obstacle."""
    ii = jnp.arange(IMG_H, dtype=jnp.float32)
    jj = jnp.arange(IMG_W, dtype=jnp.float32)
    xc = X_LOW + (ii + 0.5) * PITCH_X            # row i  -> x coordinate
    yc = Y_LOW + (jj + 0.5) * PITCH_Y            # col j  -> y coordinate
    X, Y = jnp.meshgrid(xc, yc, indexing="ij")   # (IMG_H, IMG_W)
    center = jnp.array([0.2, -0.1], jnp.float32)
    radius = 0.4
    dist_map = radius - jnp.sqrt((X - center[0]) ** 2 + (Y - center[1]) ** 2)
    return dist_map.astype(jnp.float32)


def _reference(pos_seq, dist_map):
    """Pure-JAX replica of the PyTorch forward, for correctness checking."""
    B, Hn, _ = pos_seq.shape
    p = pos_seq.reshape(B * Hn, 2)
    ix = jnp.clip((p[:, 0] - X_LOW) / PITCH_X, 0.0, IMG_H - 1).astype(jnp.int32)
    iy = jnp.clip((p[:, 1] - Y_LOW) / PITCH_Y, 0.0, IMG_W - 1).astype(jnp.int32)
    d = dist_map[ix, iy] + DIST_THRESH
    d = jnp.where(d > 0.0, 1.0, 0.0)
    return (WEIGHT * d).reshape(B, Hn)


if __name__ == "__main__":
    key = jax.random.PRNGKey(0)
    B, Hn = 2, 8                                  # batch, horizon
    pos_seq = jax.random.uniform(
        key, (B, Hn, 2), dtype=jnp.float32, minval=-0.95, maxval=0.95
    )

    dist_map = _build_dist_map()                  # (IMG_H, IMG_W)

    # TODO(synk): GaussianProjection / cached t_mat from the module never affect
    # the returned value, so they are intentionally not implemented.
    res = image_collision_cost(pos_seq, dist_map)
    res = jax.block_until_ready(res)

    ref = _reference(pos_seq, dist_map)
    assert res.shape == (B, Hn)
    assert jnp.allclose(res, ref, atol=1e-6), (res, ref)

    print("KERNEL_OK")
</pallas_src>

<mosaic_0001>
module attributes {stable_mosaic.version = 11 : i64} {
  func.func @_collision_kernel(%arg0: i32, %arg1: memref<2x128xf32, #tpu.memory_space<vmem>>, %arg2: memref<32x32xf32, #tpu.memory_space<vmem>>, %arg3: memref<1x128xf32, #tpu.memory_space<vmem>>) attributes {dimension_semantics = [#tpu.dimension_semantics<parallel>], iteration_bounds = array<i64: 1>, scalar_prefetch = 0 : i64, scratch_operands = 0 : i64, tpu.core_type = #tpu.core_type<tc>, window_params = [{transform_indices = @transform_0, window_bounds = array<i64: 2, 128>}, {pipeline_mode = #tpu.pipeline_mode<synchronous>, transform_indices = @transform_1, window_bounds = array<i64: 32, 32>}, {transform_indices = @transform_2, window_bounds = array<i64: 1, 128>}]} {
    %c0 = arith.constant 0 : index
    %c0_0 = arith.constant 0 : index
    %0 = vector.load %arg1[%c0, %c0_0] : memref<2x128xf32, #tpu.memory_space<vmem>>, vector<1x128xf32>
    %c1 = arith.constant 1 : index
    %c0_1 = arith.constant 0 : index
    %1 = vector.load %arg1[%c1, %c0_1] : memref<2x128xf32, #tpu.memory_space<vmem>>, vector<1x128xf32>
    %cst = arith.constant -1.000000e+00 : f32
    %2 = vector.broadcast %cst : f32 to vector<1x128xf32>
    %3 = arith.subf %0, %2 : vector<1x128xf32>
    %cst_2 = arith.constant 1.600000e+01 : f32
    %4 = vector.broadcast %cst_2 : f32 to vector<1x128xf32>
    %5 = arith.mulf %3, %4 : vector<1x128xf32>
    %cst_3 = arith.constant 0.000000e+00 : f32
    %cst_4 = arith.constant 3.100000e+01 : f32
    %6 = vector.broadcast %cst_3 : f32 to vector<1x128xf32>
    %7 = arith.maximumf %6, %5 : vector<1x128xf32>
    %8 = vector.broadcast %cst_4 : f32 to vector<1x128xf32>
    %9 = arith.minimumf %8, %7 : vector<1x128xf32>
    %10 = arith.fptosi %9 : vector<1x128xf32> to vector<1x128xi32>
    %cst_5 = arith.constant -1.000000e+00 : f32
    %11 = vector.broadcast %cst_5 : f32 to vector<1x128xf32>
    %12 = arith.subf %1, %11 : vector<1x128xf32>
    %cst_6 = arith.constant 1.600000e+01 : f32
    %13 = vector.broadcast %cst_6 : f32 to vector<1x128xf32>
    %14 = arith.mulf %12, %13 : vector<1x128xf32>
    %cst_7 = arith.constant 0.000000e+00 : f32
    %cst_8 = arith.constant 3.100000e+01 : f32
    %15 = vector.broadcast %cst_7 : f32 to vector<1x128xf32>
    %16 = arith.maximumf %15, %14 : vector<1x128xf32>
    %17 = vector.broadcast %cst_8 : f32 to vector<1x128xf32>
    %18 = arith.minimumf %17, %16 : vector<1x128xf32>
    %19 = arith.fptosi %18 : vector<1x128xf32> to vector<1x128xi32>
    %20 = tpu.iota {dimensions = array<i32: 0>} : vector<32x128xi32>
    %21 = vector.broadcast %19 : vector<1x128xi32> to vector<32x128xi32>
    %22 = arith.cmpi eq, %20, %21 : vector<32x128xi32>
    %23 = arith.extui %22 : vector<32x128xi1> to vector<32x128xi32>
    %24 = arith.sitofp %23 : vector<32x128xi32> to vector<32x128xf32>
    %c0_9 = arith.constant 0 : index
    %c0_10 = arith.constant 0 : index
    %25 = vector.load %arg2[%c0_9, %c0_10] : memref<32x32xf32, #tpu.memory_space<vmem>>, vector<32x32xf32>
    %cst_11 = arith.constant dense<0.000000e+00> : vector<32x128xf32>
    %26 = tpu.matmul %25, %24, %cst_11 {dimension_numbers = #tpu.dot_dimension_numbers<[1], [0], [0], [1], [0, 0, 1, 1], [], []>} : vector<32x32xf32>, vector<32x128xf32>, vector<32x128xf32> -> vector<32x128xf32>
    %27 = tpu.iota {dimensions = array<i32: 0>} : vector<32x128xi32>
    %28 = vector.broadcast %10 : vector<1x128xi32> to vector<32x128xi32>
    %29 = arith.cmpi eq, %27, %28 : vector<32x128xi32>
    %cst_12 = arith.constant 0.000000e+00 : f32
    %30 = vector.broadcast %cst_12 : f32 to vector<32x128xf32>
    %31 = arith.select %29, %26, %30 : vector<32x128xi1>, vector<32x128xf32>
    %cst_13 = arith.constant dense<0.000000e+00> : vector<128xf32>
    %32 = vector.multi_reduction <add>, %31, %cst_13 [0] : vector<32x128xf32> to vector<128xf32>
    %33 = vector.shape_cast %32 : vector<128xf32> to vector<1x128xf32>
    %cst_14 = arith.constant 0.00999999977 : f32
    %34 = vector.broadcast %cst_14 : f32 to vector<1x128xf32>
    %35 = arith.addf %33, %34 : vector<1x128xf32>
    %cst_15 = arith.constant 0.000000e+00 : f32
    %36 = vector.broadcast %cst_15 : f32 to vector<1x128xf32>
    %37 = arith.cmpf ogt, %35, %36 : vector<1x128xf32>
    %cst_16 = arith.constant 5.000000e+00 : f32
    %cst_17 = arith.constant 0.000000e+00 : f32
    %38 = vector.broadcast %cst_16 : f32 to vector<1x128xf32>
    %39 = vector.broadcast %cst_17 : f32 to vector<1x128xf32>
    %40 = arith.select %37, %38, %39 : vector<1x128xi1>, vector<1x128xf32>
    %c0_18 = arith.constant 0 : index
    %c0_19 = arith.constant 0 : index
    %41 = vector.load %arg3[%c0_18, %c0_19] : memref<1x128xf32, #tpu.memory_space<vmem>>, vector<1x128xf32>
    tpu.vector_store %arg3[%c0_18, %c0_19], %40 {strides = array<i32>} : memref<1x128xf32, #tpu.memory_space<vmem>>, vector<1x128xf32>,
    return
  }
  func.func @transform_0(%arg0: i32) -> (i32, i32) {
    %c0_i32 = arith.constant 0 : i32
    %c0_i32_0 = arith.constant 0 : i32
    return %c0_i32, %arg0 : i32, i32
  }
  func.func @transform_1(%arg0: i32) -> (i32, i32) {
    %c0_i32 = arith.constant 0 : i32
    %c0_i32_0 = arith.constant 0 : i32
    %c0_i32_1 = arith.constant 0 : i32
    return %c0_i32, %c0_i32_0 : i32, i32
  }
  func.func @transform_2(%arg0: i32) -> (i32, i32) {
    %c0_i32 = arith.constant 0 : i32
    %c0_i32_0 = arith.constant 0 : i32
    return %c0_i32, %arg0 : i32, i32
  }
}

</mosaic_0001>

<bundles_post_ra>
// kernel: tpu_custom_call.1
= control target key start
LH: loop header
LB: loop body
LE: loop exit
PB: predicated region body
PF: predicated region fallthrough
CT: control target
= control target key end

     0   :  { %7 = vsyncpa [#allocation3], 0  ;;  %s414_s0 = inlined_call_operand.hbm [shape: f32[2,128], index: 0, kind: input, shape index: {}]   ;;  %s415_s1 = inlined_call_operand.hbm [shape: f32[32,32], index: 1, kind: input, shape index: {}]   ;;  %s416_s2 = inlined_call_operand.hbm [shape: f32[1,128], index: 2, kind: output, shape index: {}]  }
   0x1   :  { %8 = vsyncpa [#allocation6], 0 }
   0x2   :  { %9 = vsyncpa [#allocation4], 0  ;;  %s345_s9 = smov [#allocation2]   ;;  %s346_s11 = smov [#allocation5]  }
   0x3   :  { %s16_s10 = sshll.u32 %s345_s9, 4  ;;  %s25_s12 = sshll.u32 %s346_s11, 4  ;;  %s17_s10 = int_to_ptr.vmem [resolvable:$true] %s16_s10  ;;  %s367_s12 = int_to_ptr.vmem [resolvable:$true] %s25_s12 }
   0x4   :  { %s273_s15 = scalar_lea.hbm %s414_s0, 32 }
   0x5   :  { %p274_p0 = scmp.ne.s32.totalorder %s414_s0, %s273_s15  ;;  %p277_p1 = scmp.lt.u32.totalorder %s273_s15, %s414_s0 }
   0x7   :  { %p279_p2 = pnand %p277_p1, %p274_p0 }
   0x9   :  { %282 = shalt.err (!%p279_p2)
}
   0xa   :  { %s283_s20 = scalar_lea.vmem %s17_s10, 32  ;;  %p288_p4 = scmp.lt.s32.totalorder %s17_s10, %s17_s10 }
   0xb   :  { %p284_p3 = scmp.ne.s32.totalorder %s17_s10, %s283_s20  ;;  %p289_p5 = scmp.lt.s32.totalorder %s283_s20, %s283_s20 }
   0xd   :  { %p290_p6 = por %p289_p5, %p288_p4 }
   0xf   :  { %p291_p7 = pnand %p290_p6, %p284_p3 }
  0x11   :  { %294 = shalt.err (!%p291_p7)
}
  0x12   :  { %19 = dma.hbm_to_vmem [thread:$0]  %s414_s0, 32, %s17_s10, [#allocation3]  }
  0x13   :  { %s295_s25 = scalar_lea.hbm %s415_s1, 512 }
  0x14   :  { %p296_p8 = scmp.ne.s32.totalorder %s415_s1, %s295_s25  ;;  %p299_p9 = scmp.lt.u32.totalorder %s295_s25, %s415_s1 }
  0x16   :  { %p301_p10 = pnand %p299_p9, %p296_p8 }
  0x18   :  { %304 = shalt.err (!%p301_p10)
}
  0x19   :  { %s305_s30 = scalar_lea.vmem %s367_s12, 512  ;;  %p310_p12 = scmp.lt.s32.totalorder %s367_s12, %s367_s12 }
  0x1a   :  { %p306_p11 = scmp.ne.s32.totalorder %s367_s12, %s305_s30  ;;  %p311_p13 = scmp.lt.s32.totalorder %s305_s30, %s305_s30 }
  0x1c   :  { %p312_p0 = por %p311_p13, %p310_p12 }
  0x1e   :  { %p313_p1 = pnand %p312_p0, %p306_p11 }
  0x20   :  { %316 = shalt.err (!%p313_p1)
}
  0x21   :  { %s347_s0 = smov 128   ;;  %s348_s3 = smov 8  }
  0x22   :  { %31 = dma.hbm_to_vmem [thread:$0]  %s415_s1, 512, %s367_s12, [#allocation6], %s347_s0, %s347_s0, %s348_s3  }
  0x23   :  { %339 = dma.done.wait [#allocation3], 32  }
  0x24   :  { %340 = vsyncadd [#allocation3], 4294967264 }
  0x25   :  { %341 = dma.done.wait [#allocation6], 512  }
  0x26   :  { %342 = vsyncadd [#allocation6], 4294966784  ;;  %vm75_vm0 = vcmask 261120   ;;  %v39_v0 = vld [vmem:[#allocation2 + $0x1] sm:$0x1]  ;;  %v71_v1 = vld [vmem:[#allocation5] sm:$0xff]  ;;  %v50_v3 = vlaneseq }
  0x27   :  { %v215_v2 = vadd.f32 1.0, %v39_v0  ;;  %244 = vmatprep.mubr.msk.f32.mxu0 %vm75_vm0, %v71_v1  ;;  %v73_v4 = vld [vmem:[#allocation5 + $0x10] sm:$0xff]  ;;  %v349_v16 = vmov 1.0|1.0   ;;  %v72_v17 = vld [vmem:[#allocation5 + $0x8] sm:$0xff]  ;;  %v74_v18 = vld [vmem:[#allocation5 + $0x18] sm:$0xff] }
  0x28   :  { %247 = vmatprep.mubr.msk.f32.mxu1 %vm75_vm0, %v73_v4  ;;  %v51_v7 = vshrl.u32 %v50_v3, 7  ;;  %v38_v19 = vld [vmem:[#allocation2] sm:$0x1]  ;;  %s350_s1 = smov [#allocation7]   ;;  %v351_v45 = vmov 0.0  }
  0x29   :  { %v46_v5 = vmul.f32 16.0, %v215_v2  ;;  %v214_v20 = vadd.f32 1.0, %v38_v19  ;;  %s204_s6 = sshll.u32 %s350_s1, 4  ;;  %s205_s6 = int_to_ptr.vmem [resolvable:$true] %s204_s6 }
  0x2a   :  { %v57_v10 = vsub.s32 0, %v51_v7  ;;  %v52_v12 = vadd.s32 8, %v51_v7  ;;  %v53_v13 = vadd.s32 16, %v51_v7  ;;  %v54_v14 = vadd.s32 24, %v51_v7  ;;  %s317_s7 = scalar_lea.vmem %s205_s6, 16  ;;  %s321_s8 = scalar_lea.vmem %s205_s6, 32 }
  0x2b   :  { %v47_v6 = vmax.f32 %v46_v5, 0.0  ;;  %v41_v21 = vmul.f32 16.0, %v214_v20  ;;  %p318_p2 = scmp.ne.s32.totalorder %s205_s6, %s317_s7  ;;  %p322_p3 = scmp.lt.s32.totalorder %s205_s6, %s205_s6 }
  0x2c   :  { %p323_p4 = scmp.lt.s32.totalorder %s321_s8, %s317_s7 }
  0x2d   :  { %v48_v8 = vmin.f32 %v47_v6, 31.0  ;;  %v42_v22 = vmax.f32 %v41_v21, 0.0 }
  0x2e   :  { %p324_p5 = por %p323_p4, %p322_p3 }
  0x2f   :  { %v264_v9 = vtrunc.f32 %v48_v8  ;;  %v43_v23 = vmin.f32 %v42_v22, 31.0 }
  0x30   :  { %p325_p6 = pnand %p324_p5, %p318_p2 }
  0x31   :  { %v265_v11 = vcvt.f32.s32 %v264_v9  ;;  %v262_v24 = vtrunc.f32 %v43_v23 }
  0x33   :  { %v58_v15 = vrot.slane %v265_v11, %v57_v10  ;;  %v263_v25 = vcvt.f32.s32 %v262_v24 }
  0x35   :  { %vm59_vm1 = vcmp.eq.s32.totalorder %v51_v7, %v58_v15  ;;  %vm60_vm2 = vcmp.eq.s32.totalorder %v52_v12, %v58_v15  ;;  %vm61_vm3 = vcmp.eq.s32.totalorder %v53_v13, %v58_v15  ;;  %vm62_vm4 = vcmp.eq.s32.totalorder %v54_v14, %v58_v15 }
  0x36   :  { %vm250_vm5 = vmpackc.low %vm60_vm2, %vm59_vm1  ;;  %v176_v26 = vrot.slane %v263_v25, %v57_v10 }
  0x37   :  { %251 = vmatprep.subr.msk.bf16.mxu0 %vm250_vm5, %v349_v16  ;;  %258 = vmatprep.subr.msk.bf16.mxu1 %vm250_vm5, %v349_v16  ;;  %vm254_vm6 = vmpackc.low %vm62_vm4, %vm61_vm3 }
  0x38   :  { %253 = vmatpush3.bf16.msk.msra.mxu0 %vm250_vm5, %v349_v16  ;;  %260 = vmatpush3.bf16.msk.msra.mxu1 %vm250_vm5, %v349_v16  ;;  %vm178_vm7 = vcmp.eq.s32.totalorder %v52_v12, %v176_v26  ;;  %vm177_vm8 = vcmp.eq.s32.totalorder %v51_v7, %v176_v26  ;;  %vm179_vm9 = vcmp.eq.s32.totalorder %v53_v13, %v176_v26 }
  0x39   :  { %255 = vmatprep.subr.msk.bf16.mxu0 %vm254_vm6, %v349_v16  ;;  %259 = vmatprep.subr.msk.bf16.mxu1 %vm254_vm6, %v349_v16  ;;  %vm180_vm10 = vcmp.eq.s32.totalorder %v54_v14, %v176_v26 }
  0x3c   :  { %257 = vmatpush3.bf16.msk.msra.mxu0 %vm254_vm6, %v349_v16  ;;  %261 = vmatpush3.bf16.msk.msra.mxu1 %vm254_vm6, %v349_v16 }
  0x3f   :  { %245 = vmatmul.mubr.msk.f32.vlgmr.msra.gmra.mrb[0].mxu0 %vm75_vm0, %v72_v17  ;;  %248 = vmatmul.mubr.msk.f32.vlgmr.msra.gmra.mrb[0].mxu1 %vm75_vm0, %v74_v18 }
 0x112   :  { %v246_v27 = vpop.f32.mrb[0].mxu0  ;;  %v249_v28 = vpop.f32.mrb[0].mxu1 }
 0x113   :  { %v182_v29 = vsel %vm178_vm7, %v246_v27, 0.0  ;;  %v154_v30 = vpop.f32.mrb[1].mxu0  ;;  %v164_v31 = vpop.f32.mrb[1].mxu1  ;;  %v184_v36 = vsel %vm180_vm10, %v249_v28, 0.0 }
 0x114   :  { %v181_v32 = vsel %vm177_vm8, %v154_v30, 0.0  ;;  %v183_v33 = vsel %vm179_vm9, %v164_v31, 0.0 }
 0x115   :  { %v185_v34 = vadd.f32 %v182_v29, %v181_v32 }
 0x117   :  { %v186_v35 = vadd.f32 %v185_v34, %v183_v33 }
 0x119   :  { %v187_v37 = vadd.f32 %v186_v35, %v184_v36 }
 0x11b   :  { %v188_v38 = vrot.slane %v187_v37, 4 }
 0x11d   :  { %v189_v39 = vadd.f32 %v188_v38, %v187_v37 }
 0x11f   :  { %v190_v40 = vrot.slane %v189_v39, 2 }
 0x121   :  { %v191_v41 = vadd.f32 %v190_v40, %v189_v39 }
 0x123   :  { %v192_v42 = vrot.slane %v191_v41, 1 }
 0x125   :  { %v193_v43 = vadd.f32 %v192_v42, %v191_v41 }
 0x127   :  { %v194_v44 = vadd.f32 0.01, %v193_v43 }
 0x129   :  { %vm195_vm11 = vcmp.gt.f32.partialorder %v194_v44, 0.0 }
 0x12a   :  { %v196_v46 = vsel %vm195_vm11, 5.0, %v351_v45 }
 0x12b   :  { %197 = vst [vmem:[#allocation7] sm:$0x1] %v196_v46 }
 0x12c   :  { %328 = shalt.err (!%p325_p6)
}
 0x12d   :  { %s329_s11 = scalar_lea.hbm %s416_s2, 16 }
 0x12e   :  { %p330_p7 = scmp.ne.s32.totalorder %s416_s2, %s329_s11  ;;  %p333_p8 = scmp.lt.u32.totalorder %s329_s11, %s416_s2 }
 0x130   :  { %p335_p9 = pnand %p333_p8, %p330_p7 }
 0x132   :  { %338 = shalt.err (!%p335_p9)
}
 0x133   :  { %207 = dma.vmem_to_hbm [thread:$0]  %s205_s6, 16, %s416_s2, [#allocation4]  }
 0x134   :  { %343 = dma.done.wait [#allocation4], 16  }
 0x135   :  { %344 = vsyncadd [#allocation4], 4294967280 }
 0x136   :  { %211 = vsyncpa [#allocation3], 1 }
 0x137   :  { %212 = vsyncpa [#allocation6], 1 }
 0x138   :  { %213 = vsyncpa [#allocation4], 1 }

</bundles_post_ra>
